<compile_context>
chip_gen: v5e
topology: v5e:2x2
jax: 0.10.0
libtpu: 0.0.40
codegen_flags: <defaults>
</compile_context>

<pallas_src>
import functools

import jax
import jax.numpy as jnp
import numpy as np
from jax.experimental import pallas as pl
from jax.experimental.pallas import tpu as pltpu

# ---- model hyper-params (mirror the PyTorch __init__ defaults) -------------
INPUT_DIM = 67
LATENT_DIM = 20
INNER1, INNER2 = 45, 30
if INNER2 > INNER1:
    INNER1, INNER2 = INNER2, INNER1
INNER1 = max(INNER1, LATENT_DIM)
INNER2 = max(INNER2, LATENT_DIM)

PAD = 128        # lane-padded hidden width: every hidden layer is one 128-wide MXU tile
MAX_TB = 512     # batch-tile ceiling; VMEM is a non-constraint (~1 MiB/tile), can sweep to 1024+
M_CHUNK = 128    # in-kernel row-chunk for MXU/VPU overlap + bounded live ranges


def _round_up(n, m):
    return ((n + m - 1) // m) * m


def _cdiv(a, b):
    return -(-a // b)


def _pick_tiling(batch):
    """Balanced, sublane-aligned batch tiles: minimal padding, >=2 tiles once B > MAX_TB."""
    n_tiles = max(1, _cdiv(batch, MAX_TB))
    tb = _round_up(_cdiv(batch, n_tiles), 16)     # 16: safe for f32 and bf16 inputs
    n_tiles = _cdiv(batch, tb)                    # re-derive: last tile is never empty
    return tb, n_tiles


# ---- kernel -----------------------------------------------------------------
def _ae_kernel(x_ref,
               w1, b1, w2, b2, w34, b34, w5, b5, w6, b6,
               o_ref):
    dot = functools.partial(jnp.dot, preferred_element_type=jnp.float32)
    cdt = w1.dtype                     # MXU operand dtype (bf16 default, or f32)
    tb = x_ref.shape[0]
    out_w = o_ref.shape[-1]

    def layer(h, w, b, relu):
        y = dot(h.astype(cdt), w[...]) + b[...]     # f32 accumulation, f32 bias add
        return jnp.maximum(y, 0.0) if relu else y

    # Statically unrolled M-chunks: independent row blocks let the scheduler overlap the
    # next chunk's matmuls with this chunk's bias/ReLU/cast epilogue.
    for start in range(0, tb, M_CHUNK):
        sz = min(M_CHUNK, tb - start)
        h = layer(x_ref[start:start + sz, :], w1, b1, True)   # 67 -> 128 (45 live) enc-L1
        h = layer(h, w2, b2, True)                            # -> 128 (30 live)   enc-L2
        h = layer(h, w34, b34, True)                          # -> 128 (30 live)   fused enc-L3+dec-L1
        h = layer(h, w5, b5, True)                            # -> 128 (45 live)   dec-L2
        y = layer(h, w6, b6, False)                           # -> 128 (67 live)   dec-L3 (no act)
        o_ref[start:start + sz, :] = y[:, :out_w].astype(o_ref.dtype)


# ---- wrapper ------------------------------------------------------------------
def autoencoder_forward(x, packed_params):
    """x: [B, INPUT_DIM] (passed in its native dtype; cast to the weight dtype happens
    in-kernel).  packed_params: output of pack_params().  Returns [B, INPUT_DIM]."""
    B = x.shape[0]
    TB, n_tiles = _pick_tiling(B)
    out_dtype = x.dtype if jnp.issubdtype(x.dtype, jnp.floating) else jnp.float32

    in_specs = [pl.BlockSpec((TB, INPUT_DIM), lambda i: (i, 0))]
    flat_params = []
    for (w, b) in packed_params:
        in_specs.append(pl.BlockSpec(w.shape, lambda i: (0, 0)))   # resident weight
        in_specs.append(pl.BlockSpec(b.shape, lambda i: (0, 0)))   # resident bias (f32)
        flat_params += [w, b]

    # Output keeps the true (B, INPUT_DIM) shape: the edge tile is a partial block and
    # Pallas drops its out-of-bounds rows on writeback -- no jnp.pad / out[:B] HBM passes.
    return pl.pallas_call(
        _ae_kernel,
        out_shape=jax.ShapeDtypeStruct((B, INPUT_DIM), out_dtype),
        grid_spec=pltpu.PrefetchScalarGridSpec(
            num_scalar_prefetch=0,
            grid=(n_tiles,),
            in_specs=in_specs,
            out_specs=pl.BlockSpec((TB, INPUT_DIM), lambda i: (i, 0)),
        ),
        compiler_params=pltpu.CompilerParams(
            dimension_semantics=("parallel",)),   # batch tiles shard across TCs on v7x
    )(x, *flat_params)


# ---- deterministic parameter init (PyTorch nn.Linear style) -----------------
def _init_linear(key, fan_in, fan_out):
    kw, kb = jax.random.split(key)
    bound = 1.0 / np.sqrt(fan_in)
    w = jax.random.uniform(kw, (fan_in, fan_out), jnp.float32, -bound, bound)
    b = jax.random.uniform(kb, (fan_out,), jnp.float32, -bound, bound)
    return w, b


def make_raw_params(key):
    dims = [(INPUT_DIM, INNER1), (INNER1, INNER2), (INNER2, LATENT_DIM),
            (LATENT_DIM, INNER2), (INNER2, INNER1), (INNER1, INPUT_DIM)]
    keys = jax.random.split(key, len(dims))
    return [_init_linear(k, fi, fo) for k, (fi, fo) in zip(keys, dims)]


def pack_params(raw_params, compute_dtype=jnp.bfloat16):
    """Fuse enc-L3/dec-L1 (no ReLU between them), zero-pad to MXU-aligned tiles,
    cast weights to the compute dtype (biases stay f32, added post-accumulation).
    bf16 operands are the default on all generations: f32 accumulation is kept, the MXU
    issue time drops ~3x vs f32 operands and weight DMA halves."""
    (w1, b1), (w2, b2), (w3, b3), (w4, b4), (w5, b5), (w6, b6) = raw_params
    # exact in f32: (h @ w3 + b3) @ w4 + b4 == h @ (w3 @ w4) + (b3 @ w4 + b4)
    w34 = w3 @ w4
    b34 = b3 @ w4 + b4

    def pad_wb(w, b, in_pad, out_pad):
        fi, fo = w.shape
        wp = jnp.zeros((in_pad, out_pad), jnp.float32).at[:fi, :fo].set(w)
        bp = jnp.zeros((1, out_pad), jnp.float32).at[0, :fo].set(b)
        return wp.astype(compute_dtype), bp

    return [
        pad_wb(w1, b1, INPUT_DIM, PAD),   # first weight keeps K=67 (x is not lane-padded)
        pad_wb(w2, b2, PAD, PAD),
        pad_wb(w34, b34, PAD, PAD),
        pad_wb(w5, b5, PAD, PAD),
        pad_wb(w6, b6, PAD, PAD),
    ]


def reference_forward(x, raw_params):
    h = x
    for li, (w, b) in enumerate(raw_params):
        h = h @ w + b
        if li not in (2, 5):          # no ReLU after latent / output layers
            h = jnp.maximum(h, 0.0)
    return h


if __name__ == "__main__":
    key = jax.random.PRNGKey(0)
    kx, kp, kx2 = jax.random.split(key, 3)

    raw_params = make_raw_params(kp)

    # --- small batch, f32 operands (single grid step, partial 16-row tile) ---
    x = jax.random.normal(kx, (2, INPUT_DIM), jnp.float32)
    y = jax.block_until_ready(
        autoencoder_forward(x, pack_params(raw_params, jnp.float32)))
    np.testing.assert_allclose(np.asarray(y),
                               np.asarray(reference_forward(x, raw_params)),
                               rtol=1e-4, atol=1e-4)

    # --- larger batch, default bf16 operands (balanced 2 x 304-row tiles,
    #     edge tile masked by Pallas partial-block writeback) ------------------
    x2 = jax.random.normal(kx2, (600, INPUT_DIM), jnp.float32)
    y2 = jax.block_until_ready(
        autoencoder_forward(x2, pack_params(raw_params)))
    np.testing.assert_allclose(np.asarray(y2),
                               np.asarray(reference_forward(x2, raw_params)),
                               rtol=5e-2, atol=5e-2)

    print("KERNEL_OK")
</pallas_src>

<mosaic_0001>
module attributes {stable_mosaic.version = 11 : i64} {
  func.func @_ae_kernel(%arg0: i32, %arg1: memref<16x67xf32, #tpu.memory_space<vmem>>, %arg2: memref<67x128xf32, #tpu.memory_space<vmem>>, %arg3: memref<1x128xf32, #tpu.memory_space<vmem>>, %arg4: memref<128x128xf32, #tpu.memory_space<vmem>>, %arg5: memref<1x128xf32, #tpu.memory_space<vmem>>, %arg6: memref<128x128xf32, #tpu.memory_space<vmem>>, %arg7: memref<1x128xf32, #tpu.memory_space<vmem>>, %arg8: memref<128x128xf32, #tpu.memory_space<vmem>>, %arg9: memref<1x128xf32, #tpu.memory_space<vmem>>, %arg10: memref<128x128xf32, #tpu.memory_space<vmem>>, %arg11: memref<1x128xf32, #tpu.memory_space<vmem>>, %arg12: memref<16x67xf32, #tpu.memory_space<vmem>>) attributes {dimension_semantics = [#tpu.dimension_semantics<parallel>], iteration_bounds = array<i64: 1>, scalar_prefetch = 0 : i64, scratch_operands = 0 : i64, tpu.core_type = #tpu.core_type<tc>, window_params = [{transform_indices = @transform_0, window_bounds = array<i64: 16, 67>}, {pipeline_mode = #tpu.pipeline_mode<synchronous>, transform_indices = @transform_1, window_bounds = array<i64: 67, 128>}, {pipeline_mode = #tpu.pipeline_mode<synchronous>, transform_indices = @transform_2, window_bounds = array<i64: 1, 128>}, {pipeline_mode = #tpu.pipeline_mode<synchronous>, transform_indices = @transform_3, window_bounds = array<i64: 128, 128>}, {pipeline_mode = #tpu.pipeline_mode<synchronous>, transform_indices = @transform_4, window_bounds = array<i64: 1, 128>}, {pipeline_mode = #tpu.pipeline_mode<synchronous>, transform_indices = @transform_5, window_bounds = array<i64: 128, 128>}, {pipeline_mode = #tpu.pipeline_mode<synchronous>, transform_indices = @transform_6, window_bounds = array<i64: 1, 128>}, {pipeline_mode = #tpu.pipeline_mode<synchronous>, transform_indices = @transform_7, window_bounds = array<i64: 128, 128>}, {pipeline_mode = #tpu.pipeline_mode<synchronous>, transform_indices = @transform_8, window_bounds = array<i64: 1, 128>}, {pipeline_mode = #tpu.pipeline_mode<synchronous>, transform_indices = @transform_9, window_bounds = array<i64: 128, 128>}, {pipeline_mode = #tpu.pipeline_mode<synchronous>, transform_indices = @transform_10, window_bounds = array<i64: 1, 128>}, {transform_indices = @transform_11, window_bounds = array<i64: 16, 67>}]} {
    %c0 = arith.constant 0 : index
    %c0_0 = arith.constant 0 : index
    %0 = vector.load %arg1[%c0, %c0_0] : memref<16x67xf32, #tpu.memory_space<vmem>>, vector<16x67xf32>
    %c0_1 = arith.constant 0 : index
    %c0_2 = arith.constant 0 : index
    %1 = vector.load %arg2[%c0_1, %c0_2] : memref<67x128xf32, #tpu.memory_space<vmem>>, vector<67x128xf32>
    %cst = arith.constant dense<0.000000e+00> : vector<16x128xf32>
    %2 = tpu.matmul %0, %1, %cst {dimension_numbers = #tpu.dot_dimension_numbers<[1], [0], [0], [1], [0, 0, 1, 1], [], []>} : vector<16x67xf32>, vector<67x128xf32>, vector<16x128xf32> -> vector<16x128xf32>
    %c0_3 = arith.constant 0 : index
    %c0_4 = arith.constant 0 : index
    %3 = vector.load %arg3[%c0_3, %c0_4] : memref<1x128xf32, #tpu.memory_space<vmem>>, vector<1x128xf32>
    %4 = vector.broadcast %3 : vector<1x128xf32> to vector<16x128xf32>
    %5 = arith.addf %2, %4 : vector<16x128xf32>
    %cst_5 = arith.constant 0.000000e+00 : f32
    %6 = vector.broadcast %cst_5 : f32 to vector<16x128xf32>
    %7 = arith.maximumf %5, %6 : vector<16x128xf32>
    %c0_6 = arith.constant 0 : index
    %c0_7 = arith.constant 0 : index
    %8 = vector.load %arg4[%c0_6, %c0_7] : memref<128x128xf32, #tpu.memory_space<vmem>>, vector<128x128xf32>
    %cst_8 = arith.constant dense<0.000000e+00> : vector<16x128xf32>
    %9 = tpu.matmul %7, %8, %cst_8 {dimension_numbers = #tpu.dot_dimension_numbers<[1], [0], [0], [1], [0, 0, 1, 1], [], []>} : vector<16x128xf32>, vector<128x128xf32>, vector<16x128xf32> -> vector<16x128xf32>
    %c0_9 = arith.constant 0 : index
    %c0_10 = arith.constant 0 : index
    %10 = vector.load %arg5[%c0_9, %c0_10] : memref<1x128xf32, #tpu.memory_space<vmem>>, vector<1x128xf32>
    %11 = vector.broadcast %10 : vector<1x128xf32> to vector<16x128xf32>
    %12 = arith.addf %9, %11 : vector<16x128xf32>
    %cst_11 = arith.constant 0.000000e+00 : f32
    %13 = vector.broadcast %cst_11 : f32 to vector<16x128xf32>
    %14 = arith.maximumf %12, %13 : vector<16x128xf32>
    %c0_12 = arith.constant 0 : index
    %c0_13 = arith.constant 0 : index
    %15 = vector.load %arg6[%c0_12, %c0_13] : memref<128x128xf32, #tpu.memory_space<vmem>>, vector<128x128xf32>
    %cst_14 = arith.constant dense<0.000000e+00> : vector<16x128xf32>
    %16 = tpu.matmul %14, %15, %cst_14 {dimension_numbers = #tpu.dot_dimension_numbers<[1], [0], [0], [1], [0, 0, 1, 1], [], []>} : vector<16x128xf32>, vector<128x128xf32>, vector<16x128xf32> -> vector<16x128xf32>
    %c0_15 = arith.constant 0 : index
    %c0_16 = arith.constant 0 : index
    %17 = vector.load %arg7[%c0_15, %c0_16] : memref<1x128xf32, #tpu.memory_space<vmem>>, vector<1x128xf32>
    %18 = vector.broadcast %17 : vector<1x128xf32> to vector<16x128xf32>
    %19 = arith.addf %16, %18 : vector<16x128xf32>
    %cst_17 = arith.constant 0.000000e+00 : f32
    %20 = vector.broadcast %cst_17 : f32 to vector<16x128xf32>
    %21 = arith.maximumf %19, %20 : vector<16x128xf32>
    %c0_18 = arith.constant 0 : index
    %c0_19 = arith.constant 0 : index
    %22 = vector.load %arg8[%c0_18, %c0_19] : memref<128x128xf32, #tpu.memory_space<vmem>>, vector<128x128xf32>
    %cst_20 = arith.constant dense<0.000000e+00> : vector<16x128xf32>
    %23 = tpu.matmul %21, %22, %cst_20 {dimension_numbers = #tpu.dot_dimension_numbers<[1], [0], [0], [1], [0, 0, 1, 1], [], []>} : vector<16x128xf32>, vector<128x128xf32>, vector<16x128xf32> -> vector<16x128xf32>
    %c0_21 = arith.constant 0 : index
    %c0_22 = arith.constant 0 : index
    %24 = vector.load %arg9[%c0_21, %c0_22] : memref<1x128xf32, #tpu.memory_space<vmem>>, vector<1x128xf32>
    %25 = vector.broadcast %24 : vector<1x128xf32> to vector<16x128xf32>
    %26 = arith.addf %23, %25 : vector<16x128xf32>
    %cst_23 = arith.constant 0.000000e+00 : f32
    %27 = vector.broadcast %cst_23 : f32 to vector<16x128xf32>
    %28 = arith.maximumf %26, %27 : vector<16x128xf32>
    %c0_24 = arith.constant 0 : index
    %c0_25 = arith.constant 0 : index
    %29 = vector.load %arg10[%c0_24, %c0_25] : memref<128x128xf32, #tpu.memory_space<vmem>>, vector<128x128xf32>
    %cst_26 = arith.constant dense<0.000000e+00> : vector<16x128xf32>
    %30 = tpu.matmul %28, %29, %cst_26 {dimension_numbers = #tpu.dot_dimension_numbers<[1], [0], [0], [1], [0, 0, 1, 1], [], []>} : vector<16x128xf32>, vector<128x128xf32>, vector<16x128xf32> -> vector<16x128xf32>
    %c0_27 = arith.constant 0 : index
    %c0_28 = arith.constant 0 : index
    %31 = vector.load %arg11[%c0_27, %c0_28] : memref<1x128xf32, #tpu.memory_space<vmem>>, vector<1x128xf32>
    %32 = vector.broadcast %31 : vector<1x128xf32> to vector<16x128xf32>
    %33 = arith.addf %30, %32 : vector<16x128xf32>
    %34 = vector.extract_strided_slice %33 {offsets = [0, 0], sizes = [16, 67], strides = [1, 1]} : vector<16x128xf32> to vector<16x67xf32>
    %c0_29 = arith.constant 0 : index
    %c0_30 = arith.constant 0 : index
    %35 = vector.load %arg12[%c0_29, %c0_30] : memref<16x67xf32, #tpu.memory_space<vmem>>, vector<16x67xf32>
    tpu.vector_store %arg12[%c0_29, %c0_30], %34 {strides = array<i32>} : memref<16x67xf32, #tpu.memory_space<vmem>>, vector<16x67xf32>,
    return
  }
  func.func @transform_0(%arg0: i32) -> (i32, i32) {
    %c0_i32 = arith.constant 0 : i32
    %c0_i32_0 = arith.constant 0 : i32
    return %arg0, %c0_i32 : i32, i32
  }
  func.func @transform_1(%arg0: i32) -> (i32, i32) {
    %c0_i32 = arith.constant 0 : i32
    %c0_i32_0 = arith.constant 0 : i32
    %c0_i32_1 = arith.constant 0 : i32
    return %c0_i32, %c0_i32_0 : i32, i32
  }
  func.func @transform_2(%arg0: i32) -> (i32, i32) {
    %c0_i32 = arith.constant 0 : i32
    %c0_i32_0 = arith.constant 0 : i32
    %c0_i32_1 = arith.constant 0 : i32
    return %c0_i32, %c0_i32_0 : i32, i32
  }
  func.func @transform_3(%arg0: i32) -> (i32, i32) {
    %c0_i32 = arith.constant 0 : i32
    %c0_i32_0 = arith.constant 0 : i32
    %c0_i32_1 = arith.constant 0 : i32
    return %c0_i32, %c0_i32_0 : i32, i32
  }
  func.func @transform_4(%arg0: i32) -> (i32, i32) {
    %c0_i32 = arith.constant 0 : i32
    %c0_i32_0 = arith.constant 0 : i32
    %c0_i32_1 = arith.constant 0 : i32
    return %c0_i32, %c0_i32_0 : i32, i32
  }
  func.func @transform_5(%arg0: i32) -> (i32, i32) {
    %c0_i32 = arith.constant 0 : i32
    %c0_i32_0 = arith.constant 0 : i32
    %c0_i32_1 = arith.constant 0 : i32
    return %c0_i32, %c0_i32_0 : i32, i32
  }
  func.func @transform_6(%arg0: i32) -> (i32, i32) {
    %c0_i32 = arith.constant 0 : i32
    %c0_i32_0 = arith.constant 0 : i32
    %c0_i32_1 = arith.constant 0 : i32
    return %c0_i32, %c0_i32_0 : i32, i32
  }
  func.func @transform_7(%arg0: i32) -> (i32, i32) {
    %c0_i32 = arith.constant 0 : i32
    %c0_i32_0 = arith.constant 0 : i32
    %c0_i32_1 = arith.constant 0 : i32
    return %c0_i32, %c0_i32_0 : i32, i32
  }
  func.func @transform_8(%arg0: i32) -> (i32, i32) {
    %c0_i32 = arith.constant 0 : i32
    %c0_i32_0 = arith.constant 0 : i32
    %c0_i32_1 = arith.constant 0 : i32
    return %c0_i32, %c0_i32_0 : i32, i32
  }
  func.func @transform_9(%arg0: i32) -> (i32, i32) {
    %c0_i32 = arith.constant 0 : i32
    %c0_i32_0 = arith.constant 0 : i32
    %c0_i32_1 = arith.constant 0 : i32
    return %c0_i32, %c0_i32_0 : i32, i32
  }
  func.func @transform_10(%arg0: i32) -> (i32, i32) {
    %c0_i32 = arith.constant 0 : i32
    %c0_i32_0 = arith.constant 0 : i32
    %c0_i32_1 = arith.constant 0 : i32
    return %c0_i32, %c0_i32_0 : i32, i32
  }
  func.func @transform_11(%arg0: i32) -> (i32, i32) {
    %c0_i32 = arith.constant 0 : i32
    %c0_i32_0 = arith.constant 0 : i32
    return %arg0, %c0_i32 : i32, i32
  }
}

</mosaic_0001>

<bundles_post_ra>
// kernel: tpu_custom_call.1
= control target key start
LH: loop header
LB: loop body
LE: loop exit
PB: predicated region body
PF: predicated region fallthrough
CT: control target
= control target key end

     0   :  { %16 = vsyncpa [#allocation3], 0  ;;  %s715_s0 = inlined_call_operand.hbm [shape: f32[2,67], index: 0, kind: input, shape index: {}]   ;;  %s716_s1 = inlined_call_operand.hbm [shape: f32[67,128], index: 1, kind: input, shape index: {}]   ;;  %s717_s2 = inlined_call_operand.vmem [shape: f32[1,128], index: 2, kind: input, shape index: {}]   ;;  %s718_s3 = inlined_call_operand.hbm [shape: f32[128,128], index: 3, kind: input, shape index: {}]   ;;  %s719_s4 = inlined_call_operand.vmem [shape: f32[1,128], index: 4, kind: input, shape index: {}]   ;;  %s720_s5 = inlined_call_operand.hbm [shape: f32[128,128], index: 5, kind: input, shape index: {}]   ;;  %s721_s6 = inlined_call_operand.vmem [shape: f32[1,128], index: 6, kind: input, shape index: {}]   ;;  %s722_s7 = inlined_call_operand.hbm [shape: f32[128,128], index: 7, kind: input, shape index: {}]   ;;  %s723_s8 = inlined_call_operand.vmem [shape: f32[1,128], index: 8, kind: input, shape index: {}]   ;;  %s724_s9 = inlined_call_operand.hbm [shape: f32[128,128], index: 9, kind: input, shape index: {}]   ;;  %s725_s10 = inlined_call_operand.vmem [shape: f32[1,128], index: 10, kind: input, shape index: {}]   ;;  %s726_s11 = inlined_call_operand.hbm [shape: f32[2,67], index: 11, kind: output, shape index: {}]  }
   0x1   :  { %17 = vsyncpa [#allocation6], 0 }
   0x2   :  { %18 = vsyncpa [#allocation9], 0 }
   0x3   :  { %19 = vsyncpa [#allocation12], 0 }
   0x4   :  { %20 = vsyncpa [#allocation4], 0  ;;  %s38_s19 = sshll.u32 %s716_s1, 4  ;;  %s39_s19 = int_to_ptr.hbm [resolvable:$true] %s38_s19 }
   0x5   :  { %24 = vsyncadd [#allocation3], 224  ;;  %s583_s20 = smov [#allocation5]   ;;  %s68_s24 = sshll.u32 %s720_s5, 4  ;;  %s69_s24 = int_to_ptr.hbm [resolvable:$true] %s68_s24 }
   0x6   :  { %s40_s21 = sshll.u32 %s583_s20, 4  ;;  %s584_s25 = smov 128   ;;  %s41_s21 = int_to_ptr.vmem [resolvable:$true] %s40_s21 }
   0x7   :  { %s585_s26 = smov 8   ;;  %s586_s27 = smov [#allocation8]  }
   0x8   :  { %46 = dma.hbm_to_vmem [thread:$0]  %s39_s19, 1152, %s41_s21, [#allocation6], %s584_s25, %s584_s25, %s585_s26  }
   0x9   :  { %s70_s28 = sshll.u32 %s586_s27, 4  ;;  %s25_s30 = sshll.u32 %s715_s0, 4  ;;  %s71_s28 = int_to_ptr.vmem [resolvable:$true] %s70_s28  ;;  %s26_s30 = int_to_ptr.hbm [resolvable:$true] %s25_s30 }
   0xa   :  { %76 = dma.hbm_to_vmem [thread:$0]  %s69_s24, 2048, %s71_s28, [#allocation9], %s584_s25, %s584_s25, %s585_s26  }
   0xb   :  { %s587_s5 = smov [#allocation2]   ;;  %s53_s15 = sshll.u32 %s718_s3, 4  ;;  %s54_s15 = int_to_ptr.hbm [resolvable:$true] %s53_s15 }
   0xc   :  { %s27_s12 = sshll.u32 %s587_s5, 4  ;;  %s588_s16 = smov 32   ;;  %s28_s12 = int_to_ptr.vmem [resolvable:$true] %s27_s12 }
   0xd   :  { %s589_s17 = smov 2   ;;  %s590_s0 = smov [#allocation7]  }
   0xe   :  { %33 = dma.hbm_to_vmem [thread:$0]  %s26_s30, 32, %s28_s12, [#allocation3], %s588_s16, %s588_s16, %s589_s17  }
   0xf   :  { %s55_s18 = sshll.u32 %s590_s0, 4  ;;  %s83_s21 = sshll.u32 %s722_s7, 4  ;;  %s56_s18 = int_to_ptr.vmem [resolvable:$true] %s55_s18  ;;  %s84_s21 = int_to_ptr.hbm [resolvable:$true] %s83_s21 }
  0x10   :  { %61 = dma.hbm_to_vmem [thread:$0]  %s54_s15, 2048, %s56_s18, [#allocation6], %s584_s25, %s584_s25, %s585_s26  }
  0x11   :  { %s98_s23 = sshll.u32 %s724_s9, 4  ;;  %s591_s24 = smov [#allocation10]   ;;  %s99_s23 = int_to_ptr.hbm [resolvable:$true] %s98_s23 }
  0x12   :  { %s85_s27 = sshll.u32 %s591_s24, 4  ;;  %s592_s28 = smov [#allocation11]   ;;  %s86_s27 = int_to_ptr.vmem [resolvable:$true] %s85_s27 }
  0x13   :  { %91 = dma.hbm_to_vmem [thread:$0]  %s84_s21, 2048, %s86_s27, [#allocation9], %s584_s25, %s584_s25, %s585_s26  }
  0x14   :  { %s100_s7 = sshll.u32 %s592_s28, 4  ;;  %s101_s7 = int_to_ptr.vmem [resolvable:$true] %s100_s7 }
  0x15   :  { %106 = dma.hbm_to_vmem [thread:$0]  %s99_s23, 2048, %s101_s7, [#allocation12], %s584_s25, %s584_s25, %s585_s26  }
  0x16   :  { %573 = dma.done.wait [#allocation3], 256  }
  0x17   :  { %574 = vsyncadd [#allocation3], 4294967040 }
  0x18   :  { %575 = dma.done.wait [#allocation6], 3200  }
  0x19   :  { %576 = vsyncadd [#allocation6], 4294964096 }
  0x1a   :  { %577 = dma.done.wait [#allocation9], 4096  }
  0x1b   :  { %578 = vsyncadd [#allocation9], 4294963200 }
  0x1c   :  { %579 = dma.done.wait [#allocation12], 2048  }
  0x1d   :  { %580 = vsyncadd [#allocation12], 4294965248  ;;  %vm155_vm0 = vcmask 1042432   ;;  %v143_v0 = vld [vmem:[#allocation5 + $0x40] sm:$0x7]  ;;  %v142_v1 = vld [vmem:[#allocation5 + $0x38] sm:$0xff] }
  0x1e   :  { %386 = vmatpush.msk.msra.mxu0 %vm155_vm0, %v143_v0  ;;  %v141_v2 = vld [vmem:[#allocation5 + $0x30] sm:$0xff]  ;;  %v199_v3 = vld [vmem:[#allocation7 + $0x78] sm:$0xff]  ;;  %v140_v4 = vld [vmem:[#allocation5 + $0x28] sm:$0xff]  ;;  %vm148_vm1 = vcmask 547840  }
  0x1f   :  { %204 = vmatpush.msra.mxu1 %v199_v3  ;;  %v198_v5 = vld [vmem:[#allocation7 + $0x70] sm:$0xff]  ;;  %v197_v6 = vld [vmem:[#allocation7 + $0x68] sm:$0xff]  ;;  %v139_v7 = vld [vmem:[#allocation5 + $0x20] sm:$0xff] }
  0x20   :  { %167 = vmatpush.msra.mxu0 %v142_v1  ;;  %v138_v8 = vld [vmem:[#allocation5 + $0x18] sm:$0xff]  ;;  %v196_v9 = vld [vmem:[#allocation7 + $0x60] sm:$0xff]  ;;  %v195_v10 = vld [vmem:[#allocation7 + $0x58] sm:$0xff] }
  0x21   :  { %205 = vmatpush.msra.mxu1 %v198_v5  ;;  %v137_v11 = vld [vmem:[#allocation5 + $0x10] sm:$0xff]  ;;  %v194_v12 = vld [vmem:[#allocation7 + $0x50] sm:$0xff]  ;;  %v136_v13 = vld [vmem:[#allocation5 + $0x8] sm:$0xff] }
  0x22   :  { %168 = vmatpush.msra.mxu0 %v141_v2  ;;  %v193_v14 = vld [vmem:[#allocation7 + $0x48] sm:$0xff]  ;;  %v135_v15 = vld [vmem:[#allocation5] sm:$0xff]  ;;  %v192_v17 = vld [vmem:[#allocation7 + $0x40] sm:$0xff] }
  0x23   :  { %206 = vmatpush.msra.mxu1 %v197_v6  ;;  %v133_v16 = vld [vmem:[#allocation2] sm:$0xff]  ;;  %v191_v18 = vld [vmem:[#allocation7 + $0x38] sm:$0xff]  ;;  %v190_v19 = vld [vmem:[#allocation7 + $0x30] sm:$0xff] }
  0x24   :  { %169 = vmatpush.msra.mxu0 %v140_v4  ;;  %v189_v20 = vld [vmem:[#allocation7 + $0x28] sm:$0xff]  ;;  %v134_v21 = vld [vmem:[#allocation2 + $0x8] sm:$0xff]  ;;  %v188_v22 = vld [vmem:[#allocation7 + $0x20] sm:$0xff] }
  0x25   :  { %207 = vmatpush.msra.mxu1 %v196_v9  ;;  %v187_v23 = vld [vmem:[#allocation7 + $0x18] sm:$0xff]  ;;  %v186_v24 = vld [vmem:[#allocation7 + $0x10] sm:$0xff]  ;;  %v185_v25 = vld [vmem:[#allocation7 + $0x8] sm:$0xff] }
  0x26   :  { %170 = vmatpush.msra.mxu0 %v139_v7  ;;  %v184_v26 = vld [vmem:[#allocation7] sm:$0xff]  ;;  %v244_v27 = vld [vmem:[#allocation8 + $0x78] sm:$0xff]  ;;  %v243_v28 = vld [vmem:[#allocation8 + $0x70] sm:$0xff] }
  0x27   :  { %208 = vmatpush.msra.mxu1 %v195_v10  ;;  %249 = vmatpush.msra.mxu2 %v244_v27  ;;  %v242_v29 = vld [vmem:[#allocation8 + $0x68] sm:$0xff]  ;;  %v241_v30 = vld [vmem:[#allocation8 + $0x60] sm:$0xff]  ;;  %v240_v31 = vld [vmem:[#allocation8 + $0x58] sm:$0xff] }
  0x28   :  { %171 = vmatpush.msra.mxu0 %v138_v8  ;;  %v239_v32 = vld [vmem:[#allocation8 + $0x50] sm:$0xff]  ;;  %v238_v33 = vld [vmem:[#allocation8 + $0x48] sm:$0xff]  ;;  %v237_v34 = vld [vmem:[#allocation8 + $0x40] sm:$0xff] }
  0x29   :  { %209 = vmatpush.msra.mxu1 %v194_v12  ;;  %250 = vmatpush.msra.mxu2 %v243_v28  ;;  %v236_v35 = vld [vmem:[#allocation8 + $0x38] sm:$0xff]  ;;  %v400_v36 = vld [vmem:[%s717_s2] ss:$0 sm:$0xff]  ;;  %v235_v37 = vld [vmem:[#allocation8 + $0x30] sm:$0xff] }
  0x2a   :  { %172 = vmatpush.msra.mxu0 %v137_v11  ;;  %v234_v38 = vld [vmem:[#allocation8 + $0x28] sm:$0xff]  ;;  %v233_v41 = vld [vmem:[#allocation8 + $0x20] sm:$0xff]  ;;  %v232_v43 = vld [vmem:[#allocation8 + $0x18] sm:$0xff] }
  0x2b   :  { %210 = vmatpush.msra.mxu1 %v193_v14  ;;  %251 = vmatpush.msra.mxu2 %v242_v29  ;;  %v231_v47 = vld [vmem:[#allocation8 + $0x10] sm:$0xff]  ;;  %v230_v48 = vld [vmem:[#allocation8 + $0x8] sm:$0xff]  ;;  %v229_v49 = vld [vmem:[#allocation8] sm:$0xff] }
  0x2c   :  { %173 = vmatpush.msra.mxu0 %v136_v13  ;;  %v289_v50 = vld [vmem:[#allocation10 + $0x78] sm:$0xff]  ;;  %v288_v51 = vld [vmem:[#allocation10 + $0x70] sm:$0xff]  ;;  %v287_v52 = vld [vmem:[#allocation10 + $0x68] sm:$0xff] }
  0x2d   :  { %211 = vmatpush.msra.mxu1 %v192_v17  ;;  %252 = vmatpush.msra.mxu2 %v241_v30  ;;  %v286_v53 = vld [vmem:[#allocation10 + $0x60] sm:$0xff]  ;;  %v285_v54 = vld [vmem:[#allocation10 + $0x58] sm:$0xff]  ;;  %v284_v55 = vld [vmem:[#allocation10 + $0x50] sm:$0xff] }
  0x2e   :  { %174 = vmatpush.msra.mxu0 %v135_v15  ;;  %294 = vmatpush.msra.mxu3 %v289_v50  ;;  %v283_v56 = vld [vmem:[#allocation10 + $0x48] sm:$0xff]  ;;  %v282_v57 = vld [vmem:[#allocation10 + $0x40] sm:$0xff]  ;;  %v281_v58 = vld [vmem:[#allocation10 + $0x38] sm:$0xff] }
  0x2f   :  { %387 = vmatmul.msk.f32.vlgmr.msra.gmra.mxu0 %vm148_vm1, %v133_v16  ;;  %212 = vmatpush.msra.mxu1 %v191_v18  ;;  %v401_v59 = vld [vmem:[%s719_s4] ss:$0 sm:$0xff]  ;;  %v280_v60 = vld [vmem:[#allocation10 + $0x30] sm:$0xff]  ;;  %v278_v0 = vld [vmem:[#allocation10 + $0x20] sm:$0xff] }
  0x30   :  { %253 = vmatpush.msra.mxu2 %v240_v31  ;;  %295 = vmatpush.msra.mxu3 %v288_v51  ;;  %v279_v61 = vld [vmem:[#allocation10 + $0x28] sm:$0xff]  ;;  %v277_v2 = vld [vmem:[#allocation10 + $0x18] sm:$0xff]  ;;  %v276_v6 = vld [vmem:[#allocation10 + $0x10] sm:$0xff] }
  0x31   :  { %213 = vmatpush.msra.mxu1 %v190_v19  ;;  %v275_v7 = vld [vmem:[#allocation10 + $0x8] sm:$0xff]  ;;  %v274_v8 = vld [vmem:[#allocation10] sm:$0xff]  ;;  %v334_v9 = vld [vmem:[#allocation11 + $0x78] sm:$0xff] }
  0x32   :  { %254 = vmatpush.msra.mxu2 %v239_v32  ;;  %296 = vmatpush.msra.mxu3 %v287_v52  ;;  %v333_v10 = vld [vmem:[#allocation11 + $0x70] sm:$0xff]  ;;  %v332_v11 = vld [vmem:[#allocation11 + $0x68] sm:$0xff]  ;;  %v331_v12 = vld [vmem:[#allocation11 + $0x60] sm:$0xff] }
  0x33   :  { %214 = vmatpush.msra.mxu1 %v189_v20  ;;  %339 = vmatpush.msrb.mxu0 %v334_v9  ;;  %v330_v13 = vld [vmem:[#allocation11 + $0x58] sm:$0xff]  ;;  %v329_v14 = vld [vmem:[#allocation11 + $0x50] sm:$0xff]  ;;  %v328_v15 = vld [vmem:[#allocation11 + $0x48] sm:$0xff] }
  0x34   :  { %255 = vmatpush.msra.mxu2 %v238_v33  ;;  %297 = vmatpush.msra.mxu3 %v286_v53  ;;  %v327_v16 = vld [vmem:[#allocation11 + $0x40] sm:$0xff]  ;;  %v326_v17 = vld [vmem:[#allocation11 + $0x38] sm:$0xff]  ;;  %v402_v18 = vld [vmem:[%s721_s6] ss:$0 sm:$0xff] }
  0x35   :  { %215 = vmatpush.msra.mxu1 %v188_v22  ;;  %340 = vmatpush.msrb.mxu0 %v333_v10  ;;  %v325_v19 = vld [vmem:[#allocation11 + $0x30] sm:$0xff]  ;;  %v324_v20 = vld [vmem:[#allocation11 + $0x28] sm:$0xff]  ;;  %v319_v31 = vld [vmem:[#allocation11] sm:$0xff] }
  0x36   :  { %256 = vmatpush.msra.mxu2 %v237_v34  ;;  %298 = vmatpush.msra.mxu3 %v285_v54  ;;  %v321_v29 = vld [vmem:[#allocation11 + $0x10] sm:$0xff]  ;;  %v320_v30 = vld [vmem:[#allocation11 + $0x8] sm:$0xff] }
  0x37   :  { %388 = vmatmul.msk.f32.gmra.mxu0 %vm148_vm1, %v134_v21  ;;  %216 = vmatpush.msra.mxu1 %v187_v23  ;;  %v323_v23 = vld [vmem:[#allocation11 + $0x20] sm:$0xff]  ;;  %v403_v32 = vld [vmem:[%s723_s8] ss:$0 sm:$0xff] }
  0x38   :  { %257 = vmatpush.msra.mxu2 %v236_v35  ;;  %299 = vmatpush.msra.mxu3 %v284_v55 }
  0x39   :  { %217 = vmatpush.msra.mxu1 %v186_v24  ;;  %341 = vmatpush.msrb.mxu0 %v332_v11 }
  0x3a   :  { %258 = vmatpush.msra.mxu2 %v235_v37  ;;  %300 = vmatpush.msra.mxu3 %v283_v56 }
  0x3b   :  { %218 = vmatpush.msra.mxu1 %v185_v25  ;;  %342 = vmatpush.msrb.mxu0 %v331_v12  ;;  %v322_v25 = vld [vmem:[#allocation11 + $0x18] sm:$0xff] }
  0x3c   :  { %259 = vmatpush.msra.mxu2 %v234_v38  ;;  %301 = vmatpush.msra.mxu3 %v282_v57 }
  0x3d   :  { %219 = vmatpush.msra.mxu1 %v184_v26  ;;  %343 = vmatpush.msrb.mxu0 %v330_v13 }
  0x3e   :  { %260 = vmatpush.msra.mxu2 %v233_v41  ;;  %302 = vmatpush.msra.mxu3 %v281_v58 }
  0x3f   :  { %344 = vmatpush.msrb.mxu0 %v329_v14 }
  0x40   :  { %261 = vmatpush.msra.mxu2 %v232_v43  ;;  %303 = vmatpush.msra.mxu3 %v280_v60 }
  0x41   :  { %345 = vmatpush.msrb.mxu0 %v328_v15 }
  0x42   :  { %262 = vmatpush.msra.mxu2 %v231_v47  ;;  %304 = vmatpush.msra.mxu3 %v279_v61 }
  0x43   :  { %346 = vmatpush.msrb.mxu0 %v327_v16 }
  0x44   :  { %263 = vmatpush.msra.mxu2 %v230_v48  ;;  %305 = vmatpush.msra.mxu3 %v278_v0 }
  0x45   :  { %347 = vmatpush.msrb.mxu0 %v326_v17 }
  0x46   :  { %264 = vmatpush.msra.mxu2 %v229_v49  ;;  %306 = vmatpush.msra.mxu3 %v277_v2 }
  0x47   :  { %348 = vmatpush.msrb.mxu0 %v325_v19 }
  0x48   :  { %307 = vmatpush.msra.mxu3 %v276_v6 }
  0x49   :  { %349 = vmatpush.msrb.mxu0 %v324_v20 }
  0x4a   :  { %308 = vmatpush.msra.mxu3 %v275_v7 }
  0x4b   :  { %350 = vmatpush.msrb.mxu0 %v323_v23 }
  0x4c   :  { %309 = vmatpush.msra.mxu3 %v274_v8 }
  0x4d   :  { %351 = vmatpush.msrb.mxu0 %v322_v25 }
  0x4f   :  { %352 = vmatpush.msrb.mxu0 %v321_v29 }
  0x51   :  { %353 = vmatpush.msrb.mxu0 %v320_v30 }
  0x53   :  { %354 = vmatpush.msrb.mxu0 %v319_v31 }
  0xac   :  { %v176_v39 = vpop.f32.mrf.mxu0 }
  0xad   :  { %v177_v40 = vadd.f32 %v400_v36, %v176_v39  ;;  %v404_v39 = vld [vmem:[%s725_s10] ss:$0 sm:$0xff] }
  0xaf   :  { %v182_v42 = vmax.f32 %v177_v40, 0.0 }
  0xb1   :  { %220 = vmatmul.f32.vlgmr.msra.gmra.mxu1 %v182_v42 }
  0xb4   :  { %v179_v44 = vpop.f32.mrf.mxu0 }
  0xb5   :  { %v180_v45 = vadd.f32 %v400_v36, %v179_v44 }
  0xb7   :  { %v183_v46 = vmax.f32 %v180_v45, 0.0 }
  0xb9   :  { %223 = vmatmul.f32.gmra.mxu1 %v183_v46 }
 0x12e   :  { %v221_v62 = vpop.f32.mrf.mxu1 }
 0x12f   :  { %v222_v63 = vadd.f32 %v401_v59, %v221_v62 }
 0x131   :  { %v227_v1 = vmax.f32 %v222_v63, 0.0 }
 0x133   :  { %265 = vmatmul.f32.vlgmr.msra.gmra.mxu2 %v227_v1 }
 0x136   :  { %v224_v3 = vpop.f32.mrf.mxu1 }
 0x137   :  { %v225_v4 = vadd.f32 %v401_v59, %v224_v3 }
 0x139   :  { %v228_v5 = vmax.f32 %v225_v4, 0.0 }
 0x13b   :  { %268 = vmatmul.f32.gmra.mxu2 %v228_v5 }
 0x1b6   :  { %v266_v21 = vpop.f32.mrf.mxu2 }
 0x1b7   :  { %v267_v22 = vadd.f32 %v402_v18, %v266_v21 }
 0x1b9   :  { %v272_v24 = vmax.f32 %v267_v22, 0.0 }
 0x1bb   :  { %310 = vmatmul.f32.vlgmr.msra.gmra.mxu3 %v272_v24 }
 0x1be   :  { %v269_v26 = vpop.f32.mrf.mxu2 }
 0x1bf   :  { %v270_v27 = vadd.f32 %v402_v18, %v269_v26 }
 0x1c1   :  { %v273_v28 = vmax.f32 %v270_v27, 0.0 }
 0x1c3   :  { %313 = vmatmul.f32.gmra.mxu3 %v273_v28 }
 0x23e   :  { %v311_v33 = vpop.f32.mrf.mxu3 }
 0x23f   :  { %v312_v34 = vadd.f32 %v403_v32, %v311_v33 }
 0x241   :  { %v317_v35 = vmax.f32 %v312_v34, 0.0 }
 0x243   :  { %355 = vmatmul.f32.vlgmr.msrb.gmra.mxu0 %v317_v35 }
 0x246   :  { %v314_v36 = vpop.f32.mrf.mxu3 }
 0x247   :  { %v315_v37 = vadd.f32 %v403_v32, %v314_v36 }
 0x249   :  { %v318_v38 = vmax.f32 %v315_v37, 0.0 }
 0x24b   :  { %358 = vmatmul.f32.gmra.mxu0 %v318_v38 }
 0x2c0   :  { %v356_v40 = vpop.f32.mrf.mxu0 }
 0x2c1   :  { %v357_v41 = vadd.f32 %v404_v39, %v356_v40 }
 0x2c3   :  { %362 = vst.msk [vmem:[#allocation13] sm:$0xff] %vm148_vm1, %v357_v41 }
 0x2c8   :  { %v359_v42 = vpop.f32.mrf.mxu0 }
 0x2c9   :  { %v360_v43 = vadd.f32 %v404_v39, %v359_v42 }
 0x2cb   :  { %363 = vst.msk [vmem:[#allocation13 + $0x8] sm:$0xff] %vm148_vm1, %v360_v43 }
 0x2cc   :  { %367 = vsyncadd [#allocation4], 224  ;;  %s370_s13 = sshll.u32 %s726_s11, 4  ;;  %s593_s14 = smov [#allocation13]   ;;  %s371_s13 = int_to_ptr.hbm [resolvable:$true] %s370_s13 }
 0x2cd   :  { %s368_s15 = sshll.u32 %s593_s14, 4  ;;  %s369_s15 = int_to_ptr.vmem [resolvable:$true] %s368_s15 }
 0x2ce   :  { %376 = dma.vmem_to_hbm [thread:$0]  %s369_s15, 32, %s371_s13, [#allocation4], %s588_s16, %s588_s16, %s589_s17  }
 0x2cf   :  { %581 = dma.done.wait [#allocation4], 256  }
 0x2d0   :  { %582 = vsyncadd [#allocation4], 4294967040 }
 0x2d1   :  { %381 = vsyncpa [#allocation3], 1 }
 0x2d2   :  { %382 = vsyncpa [#allocation6], 1 }
 0x2d3   :  { %383 = vsyncpa [#allocation9], 1 }
 0x2d4   :  { %384 = vsyncpa [#allocation12], 1 }
 0x2d5   :  { %385 = vsyncpa [#allocation4], 1 }

</bundles_post_ra>
